<compile_context>
chip_gen: v6e
topology: v6e:2x2x1
jax: 0.10.0
libtpu: 0.0.40
codegen_flags: <defaults>
</compile_context>

<pallas_src>
import math

import jax
import jax.numpy as jnp
from jax.experimental import pallas as pl
from jax.experimental.pallas import tpu as pltpu


def _round_up(x, m):
    return ((x + m - 1) // m) * m


def _make_mlp_kernel(num_inputs):
    """Fused: out = relu(sum_i x_i @ W1_i + b1) @ W2 + b2 (dropout p=0.0 = identity)."""

    def kernel(*refs):
        x_refs = refs[:num_inputs]
        w1_refs = refs[num_inputs:2 * num_inputs]
        b1_ref, w2_ref, b2_ref, o_ref = refs[2 * num_inputs:]

        # Hidden layer: per-input partial matmuls accumulate in f32 on the MXU.
        # (Equivalent to concat(x_i) @ W1 without materializing the concat;
        # f32 summation order differs from a single matmul -> tolerance-level
        # differences vs the PyTorch reference, not bit-identical.)
        h = jnp.dot(x_refs[0][...], w1_refs[0][...],
                    preferred_element_type=jnp.float32)
        for x_ref, w_ref in zip(x_refs[1:], w1_refs[1:]):
            h = h + jnp.dot(x_ref[...], w_ref[...],
                            preferred_element_type=jnp.float32)
        h = jnp.maximum(h + b1_ref[...], 0.0)  # bias + ReLU (VPU)

        # Output layer; output_activation=None -> Identity.
        # NOTE: when N is not a multiple of tn, the padded rows of the last
        # block compute on stale VMEM contents; Pallas masks the out-of-bounds
        # writeback so this is benign — never read the padded region elsewhere.
        out = jnp.dot(h, w2_ref[...], preferred_element_type=jnp.float32) + b2_ref[...]
        o_ref[...] = out.astype(o_ref.dtype)

    return kernel


def mlp_forward(xs, w1, b1, w2, b2, *, block_n=8192, x_buffering=None):
    """Run the fused MLP. xs: list of [N, d_i] arrays; returns [N, d_out].

    block_n:      target batch tile (rounded to a multiple of 8).
    x_buffering:  optional pipeline depth (e.g. 3) for the x_i streams only;
                  leave None for the default double buffering.
    """
    xs = list(xs)
    n = int(xs[0].shape[0])
    dims = [int(x.shape[1]) for x in xs]
    d_in = sum(dims)
    hidden = int(w1.shape[1])
    d_out = int(w2.shape[1])
    out_dtype = xs[0].dtype
    assert d_in == int(w1.shape[0])

    # Row-slices of W1 matching each input; tiny, VMEM-resident for the grid.
    w1_chunks = []
    off = 0
    for d in dims:
        w1_chunks.append(w1[off:off + d, :])
        off += d

    # --- Batch tile selection -------------------------------------------------
    # Big tiles amortize per-step overhead; when more than one step is needed,
    # round the step count up to an even number and re-balance the tile so a
    # v7x "parallel" batch axis splits evenly across both TensorCores.
    if n <= block_n:
        tn = _round_up(n, 8)
    else:
        steps = pl.cdiv(n, block_n)
        steps = steps + (steps % 2)          # even number of steps (>= 2)
        tn = _round_up(pl.cdiv(n, steps), 8)
    grid = (pl.cdiv(n, tn),)

    x_pipeline_kwargs = {}
    if x_buffering is not None and x_buffering > 2:
        x_pipeline_kwargs = dict(pipeline_mode=pl.Buffered(int(x_buffering)))

    in_specs = (
        [pl.BlockSpec((tn, d), lambda i: (i, 0), **x_pipeline_kwargs)
         for d in dims]                                                # x_i: streamed over N
        + [pl.BlockSpec((d, hidden), lambda i: (0, 0)) for d in dims]  # W1_i: VMEM-resident
        + [
            pl.BlockSpec((1, hidden), lambda i: (0, 0)),               # b1: resident
            pl.BlockSpec((hidden, d_out), lambda i: (0, 0)),           # W2: resident
            pl.BlockSpec((1, d_out), lambda i: (0, 0)),                # b2: resident
        ]
    )
    out_specs = pl.BlockSpec((tn, d_out), lambda i: (i, 0))

    # Advisory cost model so XLA schedules the custom call against neighbors.
    x_itemsize = jnp.dtype(xs[0].dtype).itemsize
    w_itemsize = jnp.dtype(w1.dtype).itemsize
    out_itemsize = jnp.dtype(out_dtype).itemsize
    flops = 2 * n * (d_in * hidden + hidden * d_out)
    bytes_accessed = (
        x_itemsize * n * d_in
        + w_itemsize * (d_in * hidden + hidden + hidden * d_out + d_out)
        + out_itemsize * n * d_out
    )
    cost = pl.CostEstimate(flops=flops, transcendentals=0,
                           bytes_accessed=bytes_accessed)

    # --- Honest VMEM accounting ----------------------------------------------
    # streamed x tiles (pipeline depth per spec) + double-buffered output tile
    # + resident params (Pallas still double-buffers their single block)
    # + the tn*hidden f32 intermediate produced inside the kernel body.
    x_depth = int(x_buffering) if (x_buffering is not None and x_buffering > 2) else 2
    vmem_need = (
        x_depth * x_itemsize * tn * d_in            # x_i stream buffers
        + 2 * out_itemsize * tn * d_out             # output tile buffers
        + 2 * w_itemsize * (d_in * hidden + hidden + hidden * d_out + d_out)
        + 4 * tn * hidden                           # f32 hidden intermediate
    )
    # v5e default scoped-VMEM is 16 MiB; raise explicitly (with headroom) when
    # we get near it, capped at 64 MiB so the config is also safe on v7x.
    vmem_limit = None
    if vmem_need > 12 * 1024 * 1024:
        vmem_limit = min(_round_up(2 * vmem_need, 1024 * 1024), 64 * 1024 * 1024)

    return pl.pallas_call(
        _make_mlp_kernel(len(xs)),
        out_shape=jax.ShapeDtypeStruct((n, d_out), out_dtype),
        grid_spec=pltpu.PrefetchScalarGridSpec(
            num_scalar_prefetch=0,
            grid=grid,
            in_specs=in_specs,
            out_specs=out_specs,
        ),
        compiler_params=pltpu.CompilerParams(
            # Batch tiles are independent -> shard across both TCs on v7x.
            # (If xprof shows a single TC doing all steps, switch this axis to
            #  pltpu.CORE_PARALLEL; harmless either way on v5e/v6e.)
            dimension_semantics=("parallel",),
            vmem_limit_bytes=vmem_limit,
        ),
        cost_estimate=cost,
    )(*xs, *w1_chunks, b1, w2, b2)


def init_linear_params(key, fan_in, fan_out, dtype=jnp.float32):
    """Deterministic init mimicking PyTorch nn.Linear default (uniform +-1/sqrt(fan_in))."""
    kw, kb = jax.random.split(key)
    bound = 1.0 / math.sqrt(fan_in)
    w = jax.random.uniform(kw, (fan_in, fan_out), dtype, minval=-bound, maxval=bound)
    b = jax.random.uniform(kb, (1, fan_out), dtype, minval=-bound, maxval=bound)
    return w, b


def mlpnet_apply(inputs, params, **kwargs):
    """Mirrors MLPNet.forward: concat(inputs, -1) -> MLP. The concat is folded
    into the kernel as a split-W1 accumulation instead of an HBM round trip."""
    if not isinstance(inputs, (list, tuple)):
        inputs = [inputs]
    w1, b1, w2, b2 = params
    return mlp_forward(list(inputs), w1, b1, w2, b2, **kwargs)


def _reference(xs, params):
    w1, b1, w2, b2 = params
    x = jnp.concatenate(list(xs), axis=-1)
    return jnp.maximum(x @ w1 + b1, 0.0) @ w2 + b2


if __name__ == "__main__":
    key = jax.random.PRNGKey(0)
    k_x1, k_x2, k_l1, k_l2, k_big1, k_big2 = jax.random.split(key, 6)

    # Shapes consistent with the module:
    #   input_dims = (8, 8) -> concat dim 16, hidden_layer_sizes=(64,), output_dim = 8
    batch = 16
    input_dims = (8, 8)
    hidden = 64
    output_dim = 8

    d_in = sum(input_dims)
    w1, b1 = init_linear_params(k_l1, d_in, hidden)
    w2, b2 = init_linear_params(k_l2, hidden, output_dim)
    params = (w1, b1, w2, b2)

    # --- small run (single grid step) ---
    x1 = jax.random.normal(k_x1, (batch, input_dims[0]), jnp.float32)
    x2 = jax.random.normal(k_x2, (batch, input_dims[1]), jnp.float32)
    out = jax.block_until_ready(mlpnet_apply([x1, x2], params))
    ref = _reference([x1, x2], params)
    assert out.shape == (batch, output_dim)
    assert jnp.allclose(out, ref, atol=1e-5, rtol=1e-5)

    # --- larger run (exercises the multi-step, megacore-splittable grid) ---
    big_n = 12000  # > block_n -> 2 even grid steps of tn=6000
    xb1 = jax.random.normal(k_big1, (big_n, input_dims[0]), jnp.float32)
    xb2 = jax.random.normal(k_big2, (big_n, input_dims[1]), jnp.float32)
    out_big = jax.block_until_ready(mlpnet_apply([xb1, xb2], params))
    ref_big = _reference([xb1, xb2], params)
    assert out_big.shape == (big_n, output_dim)
    assert jnp.allclose(out_big, ref_big, atol=1e-4, rtol=1e-5)

    print("KERNEL_OK")
</pallas_src>

<mosaic_0001>
module attributes {stable_mosaic.version = 11 : i64} {
  func.func @kernel(%arg0: i32, %arg1: memref<16x8xf32, #tpu.memory_space<vmem>>, %arg2: memref<16x8xf32, #tpu.memory_space<vmem>>, %arg3: memref<8x64xf32, #tpu.memory_space<vmem>>, %arg4: memref<8x64xf32, #tpu.memory_space<vmem>>, %arg5: memref<1x64xf32, #tpu.memory_space<vmem>>, %arg6: memref<64x8xf32, #tpu.memory_space<vmem>>, %arg7: memref<1x8xf32, #tpu.memory_space<vmem>>, %arg8: memref<16x8xf32, #tpu.memory_space<vmem>>) attributes {dimension_semantics = [#tpu.dimension_semantics<parallel>], iteration_bounds = array<i64: 1>, scalar_prefetch = 0 : i64, scratch_operands = 0 : i64, tpu.core_type = #tpu.core_type<tc>, window_params = [{transform_indices = @transform_0, window_bounds = array<i64: 16, 8>}, {transform_indices = @transform_1, window_bounds = array<i64: 16, 8>}, {pipeline_mode = #tpu.pipeline_mode<synchronous>, transform_indices = @transform_2, window_bounds = array<i64: 8, 64>}, {pipeline_mode = #tpu.pipeline_mode<synchronous>, transform_indices = @transform_3, window_bounds = array<i64: 8, 64>}, {pipeline_mode = #tpu.pipeline_mode<synchronous>, transform_indices = @transform_4, window_bounds = array<i64: 1, 64>}, {pipeline_mode = #tpu.pipeline_mode<synchronous>, transform_indices = @transform_5, window_bounds = array<i64: 64, 8>}, {pipeline_mode = #tpu.pipeline_mode<synchronous>, transform_indices = @transform_6, window_bounds = array<i64: 1, 8>}, {transform_indices = @transform_7, window_bounds = array<i64: 16, 8>}]} {
    %c0 = arith.constant 0 : index
    %c0_0 = arith.constant 0 : index
    %0 = vector.load %arg1[%c0, %c0_0] : memref<16x8xf32, #tpu.memory_space<vmem>>, vector<16x8xf32>
    %c0_1 = arith.constant 0 : index
    %c0_2 = arith.constant 0 : index
    %1 = vector.load %arg3[%c0_1, %c0_2] : memref<8x64xf32, #tpu.memory_space<vmem>>, vector<8x64xf32>
    %cst = arith.constant dense<0.000000e+00> : vector<16x64xf32>
    %2 = tpu.matmul %0, %1, %cst {dimension_numbers = #tpu.dot_dimension_numbers<[1], [0], [0], [1], [0, 0, 1, 1], [], []>} : vector<16x8xf32>, vector<8x64xf32>, vector<16x64xf32> -> vector<16x64xf32>
    %c0_3 = arith.constant 0 : index
    %c0_4 = arith.constant 0 : index
    %3 = vector.load %arg2[%c0_3, %c0_4] : memref<16x8xf32, #tpu.memory_space<vmem>>, vector<16x8xf32>
    %c0_5 = arith.constant 0 : index
    %c0_6 = arith.constant 0 : index
    %4 = vector.load %arg4[%c0_5, %c0_6] : memref<8x64xf32, #tpu.memory_space<vmem>>, vector<8x64xf32>
    %cst_7 = arith.constant dense<0.000000e+00> : vector<16x64xf32>
    %5 = tpu.matmul %3, %4, %cst_7 {dimension_numbers = #tpu.dot_dimension_numbers<[1], [0], [0], [1], [0, 0, 1, 1], [], []>} : vector<16x8xf32>, vector<8x64xf32>, vector<16x64xf32> -> vector<16x64xf32>
    %6 = arith.addf %2, %5 : vector<16x64xf32>
    %c0_8 = arith.constant 0 : index
    %c0_9 = arith.constant 0 : index
    %7 = vector.load %arg5[%c0_8, %c0_9] : memref<1x64xf32, #tpu.memory_space<vmem>>, vector<1x64xf32>
    %8 = vector.broadcast %7 : vector<1x64xf32> to vector<16x64xf32>
    %9 = arith.addf %6, %8 : vector<16x64xf32>
    %cst_10 = arith.constant 0.000000e+00 : f32
    %10 = vector.broadcast %cst_10 : f32 to vector<16x64xf32>
    %11 = arith.maximumf %9, %10 : vector<16x64xf32>
    %c0_11 = arith.constant 0 : index
    %c0_12 = arith.constant 0 : index
    %12 = vector.load %arg6[%c0_11, %c0_12] : memref<64x8xf32, #tpu.memory_space<vmem>>, vector<64x8xf32>
    %cst_13 = arith.constant dense<0.000000e+00> : vector<16x8xf32>
    %13 = tpu.matmul %11, %12, %cst_13 {dimension_numbers = #tpu.dot_dimension_numbers<[1], [0], [0], [1], [0, 0, 1, 1], [], []>} : vector<16x64xf32>, vector<64x8xf32>, vector<16x8xf32> -> vector<16x8xf32>
    %c0_14 = arith.constant 0 : index
    %c0_15 = arith.constant 0 : index
    %14 = vector.load %arg7[%c0_14, %c0_15] : memref<1x8xf32, #tpu.memory_space<vmem>>, vector<1x8xf32>
    %15 = vector.broadcast %14 : vector<1x8xf32> to vector<16x8xf32>
    %16 = arith.addf %13, %15 : vector<16x8xf32>
    %c0_16 = arith.constant 0 : index
    %c0_17 = arith.constant 0 : index
    %17 = vector.load %arg8[%c0_16, %c0_17] : memref<16x8xf32, #tpu.memory_space<vmem>>, vector<16x8xf32>
    tpu.vector_store %arg8[%c0_16, %c0_17], %16 {strides = array<i32>} : memref<16x8xf32, #tpu.memory_space<vmem>>, vector<16x8xf32>,
    return
  }
  func.func @transform_0(%arg0: i32) -> (i32, i32) {
    %c0_i32 = arith.constant 0 : i32
    %c0_i32_0 = arith.constant 0 : i32
    return %arg0, %c0_i32 : i32, i32
  }
  func.func @transform_1(%arg0: i32) -> (i32, i32) {
    %c0_i32 = arith.constant 0 : i32
    %c0_i32_0 = arith.constant 0 : i32
    return %arg0, %c0_i32 : i32, i32
  }
  func.func @transform_2(%arg0: i32) -> (i32, i32) {
    %c0_i32 = arith.constant 0 : i32
    %c0_i32_0 = arith.constant 0 : i32
    %c0_i32_1 = arith.constant 0 : i32
    return %c0_i32, %c0_i32_0 : i32, i32
  }
  func.func @transform_3(%arg0: i32) -> (i32, i32) {
    %c0_i32 = arith.constant 0 : i32
    %c0_i32_0 = arith.constant 0 : i32
    %c0_i32_1 = arith.constant 0 : i32
    return %c0_i32, %c0_i32_0 : i32, i32
  }
  func.func @transform_4(%arg0: i32) -> (i32, i32) {
    %c0_i32 = arith.constant 0 : i32
    %c0_i32_0 = arith.constant 0 : i32
    %c0_i32_1 = arith.constant 0 : i32
    return %c0_i32, %c0_i32_0 : i32, i32
  }
  func.func @transform_5(%arg0: i32) -> (i32, i32) {
    %c0_i32 = arith.constant 0 : i32
    %c0_i32_0 = arith.constant 0 : i32
    %c0_i32_1 = arith.constant 0 : i32
    return %c0_i32, %c0_i32_0 : i32, i32
  }
  func.func @transform_6(%arg0: i32) -> (i32, i32) {
    %c0_i32 = arith.constant 0 : i32
    %c0_i32_0 = arith.constant 0 : i32
    %c0_i32_1 = arith.constant 0 : i32
    return %c0_i32, %c0_i32_0 : i32, i32
  }
  func.func @transform_7(%arg0: i32) -> (i32, i32) {
    %c0_i32 = arith.constant 0 : i32
    %c0_i32_0 = arith.constant 0 : i32
    return %arg0, %c0_i32 : i32, i32
  }
}

</mosaic_0001>

<bundles_post_ra>
// kernel: tpu_custom_call.1
= control target key start
LH: loop header
LB: loop body
LE: loop exit
PB: predicated region body
PF: predicated region fallthrough
CT: control target
= control target key end

     0   :  { %vm32_vm0 = vcmask 64512   ;;  %vm221_vm1 = vcmask 523264   ;;  %s462_s3 = inlined_call_operand.vmem [shape: f32[8,64], index: 3, kind: input, shape index: {}]   ;;  %s463_s1 = inlined_call_operand.vmem [shape: f32[16,8], index: 1, kind: input, shape index: {}]   ;;  %s464_s2 = inlined_call_operand.vmem [shape: f32[8,64], index: 2, kind: input, shape index: {}]   ;;  %s465_s0 = inlined_call_operand.vmem [shape: f32[16,8], index: 0, kind: input, shape index: {}]   ;;  %s466_s5 = inlined_call_operand.vmem [shape: f32[64,8], index: 5, kind: input, shape index: {}]   ;;  %s467_s4 = inlined_call_operand.vmem [shape: f32[1,64], index: 4, kind: input, shape index: {}]   ;;  %s468_s6 = inlined_call_operand.vmem [shape: f32[1,8], index: 6, kind: input, shape index: {}]   ;;  %s469_s7 = inlined_call_operand.vmem [shape: f32[16,8], index: 7, kind: output, shape index: {}]  }
   0x1   :  { %v31_v0 = vld [vmem:[%s462_s3] sm:$0xff]  ;;  %v30_v2 = vld [vmem:[%s463_s1 + $0x8] sm:$0xff]  ;;  %v213_v5 = vld [vmem:[%s466_s5 + $0x38] sm:$0xff] }
   0x2   :  { %v29_v1 = vld [vmem:[%s463_s1] sm:$0xff]  ;;  %333 = vmatprep.subr.mxu1 %v31_v0  ;;  %v27_v6 = vld [vmem:[%s465_s0 + $0x8] sm:$0xff]  ;;  %343 = vmatprep.subr.mxu0 %v213_v5  ;;  %v212_v7 = vld [vmem:[%s466_s5 + $0x30] sm:$0xff] }
   0x3   :  { %335 = vmatprep.mubr.msk.f32.mxu1 %vm32_vm0, %v29_v1  ;;  %v28_v3 = vld [vmem:[%s464_s2] sm:$0xff]  ;;  %334 = vmatpush3.msra.mxu1 %v31_v0  ;;  %v211_v8 = vld [vmem:[%s466_s5 + $0x28] sm:$0xff]  ;;  %v209_v10 = vld [vmem:[%s466_s5 + $0x18] sm:$0xff] }
   0x4   :  { %v26_v4 = vld [vmem:[%s465_s0] sm:$0xff]  ;;  %336 = vmatmul.mubr.msk.f32.vlgmr.msra.gmra.mxu1 %vm32_vm0, %v30_v2  ;;  %338 = vmatprep.subr.mxu1 %v28_v3  ;;  %v208_v11 = vld [vmem:[%s466_s5 + $0x10] sm:$0xff]  ;;  %v207_v12 = vld [vmem:[%s466_s5 + $0x8] sm:$0xff] }
   0x5   :  { %339 = vmatpush3.msra.mxu1 %v28_v3  ;;  %340 = vmatprep.mubr.msk.f32.mxu1 %vm32_vm0, %v26_v4  ;;  %v210_v9 = vld [vmem:[%s466_s5 + $0x20] sm:$0xff] }
   0x6   :  { %344 = vmatpush3.msra.mxu0 %v213_v5  ;;  %v206_v13 = vld [vmem:[%s466_s5] sm:$0xff] }
   0x7   :  { %345 = vmatprep.subr.mxu0 %v212_v7  ;;  %v313_v18 = vld [vmem:[%s467_s4] ss:$0 sm:$0xff] }
   0x8   :  { %341 = vmatmul.mubr.msk.f32.vlgmr.msra.gmra.mxu1 %vm32_vm0, %v27_v6  ;;  %346 = vmatpush3.msra.mxu0 %v212_v7  ;;  %v314_v25 = vld [vmem:[%s468_s6] ss:$0 sm:$0xff] }
   0x9   :  { %347 = vmatprep.subr.mxu0 %v211_v8 }
   0xa   :  { %348 = vmatpush3.msra.mxu0 %v211_v8 }
   0xb   :  { %349 = vmatprep.subr.mxu0 %v210_v9 }
   0xc   :  { %350 = vmatpush3.msra.mxu0 %v210_v9 }
   0xd   :  { %351 = vmatprep.subr.mxu0 %v209_v10 }
   0xe   :  { %352 = vmatpush3.msra.mxu0 %v209_v10 }
   0xf   :  { %353 = vmatprep.subr.mxu0 %v208_v11 }
  0x10   :  { %354 = vmatpush3.msra.mxu0 %v208_v11 }
  0x11   :  { %355 = vmatprep.subr.mxu0 %v207_v12 }
  0x12   :  { %356 = vmatpush3.msra.mxu0 %v207_v12 }
  0x13   :  { %357 = vmatprep.subr.mxu0 %v206_v13 }
  0x14   :  { %358 = vmatpush3.msra.mxu0 %v206_v13 }
  0xc4   :  { %v337_v14 = vpop.f32.mrf.mxu1 }
  0xc6   :  { %v105_v15 = vpop.f32.mrf.mxu1 }
  0xc8   :  { %v342_v16 = vpop.f32.mrf.mxu1 }
  0xc9   :  { %v192_v17 = vadd.f32 %v342_v16, %v337_v14 }
  0xca   :  { %v186_v19 = vpop.f32.mrf.mxu1 }
  0xcb   :  { %v187_v20 = vadd.f32 %v186_v19, %v105_v15  ;;  %v203_v21 = vadd.f32 %v313_v18, %v192_v17 }
  0xcd   :  { %v202_v22 = vadd.f32 %v313_v18, %v187_v20  ;;  %v205_v24 = vmax.f32 %v203_v21, 0.0 }
  0xcf   :  { %v204_v23 = vmax.f32 %v202_v22, 0.0 }
  0xd1   :  { %359 = vmatprep.mubr.msk.f32.mxu0 %vm221_vm1, %v204_v23 }
  0xd2   :  { %360 = vmatmul.mubr.msk.f32.vlgmr.msra.gmra.mxu0 %vm221_vm1, %v205_v24 }
 0x192   :  { %v361_v26 = vpop.f32.mrf.mxu0 }
 0x193   :  { %v300_v27 = vadd.f32 %v361_v26, %v314_v25 }
 0x194   :  { %v294_v28 = vpop.f32.mrf.mxu0 }
 0x195   :  { %304 = vst.msk [vmem:[%s469_s7 + $0x8] sm:$0xff] %vm32_vm0, %v300_v27  ;;  %v295_v29 = vadd.f32 %v314_v25, %v294_v28 }
 0x197   :  { %303 = vst.msk [vmem:[%s469_s7] sm:$0xff] %vm32_vm0, %v295_v29 }

</bundles_post_ra>
